<compile_context>
chip_gen: v5e
topology: v5e:2x2
jax: 0.10.0
libtpu: 0.0.40
codegen_flags: <defaults>
</compile_context>

<pallas_src>
import math
import functools

import jax
import jax.numpy as jnp
from jax.experimental import pallas as pl
from jax.experimental.pallas import tpu as pltpu


_INV_SQRT2 = 1.0 / math.sqrt(2.0)
_SQRT_2_OVER_PI = math.sqrt(2.0 / math.pi)


def _ffn_kernel(x_ref, w1_ref, b1_ref, w2_ref, b2_ref, o_ref, *, approx_gelu):
    # x_ref:  (tm, P*dim)            packed token tile (input dtype, e.g. f32)
    # w1_ref: (P*dim, P*inner)       block-diagonal first Linear weight (bf16)
    # b1_ref: (1, P*inner)           lane-tiled first Linear bias (f32)
    # w2_ref: (P*inner, P*dim_out)   block-diagonal second Linear weight (bf16)
    # b2_ref: (1, P*dim_out)         lane-tiled second Linear bias (f32)
    # o_ref:  (tm, P*dim_out)
    #
    # Cast to the MXU compute dtype in-kernel (VPU op, hidden under DMA);
    # keeps the HBM-side x traffic at its native dtype with no staging pass.
    x = x_ref[...].astype(w1_ref.dtype)
    h = jnp.dot(x, w1_ref[...], preferred_element_type=jnp.float32)
    h = h + b1_ref[...]
    if approx_gelu:
        # tanh-approx GELU: one EUP tanh + a few VPU muls (perf option).
        inner = _SQRT_2_OVER_PI * (h + 0.044715 * h * h * h)
        h = 0.5 * h * (1.0 + jnp.tanh(inner))
    else:
        # Exact erf GELU (matches torch.nn.GELU default), computed in f32.
        h = 0.5 * h * (1.0 + jax.lax.erf(h * _INV_SQRT2))
    # Dropout(p=0.0) is the identity.
    y = jnp.dot(h.astype(w2_ref.dtype), w2_ref[...],
                preferred_element_type=jnp.float32)
    y = y + b2_ref[...]
    o_ref[...] = y.astype(o_ref.dtype)


def _round_up(x, m):
    return ((x + m - 1) // m) * m


def _block_diag(w, pack):
    """pack copies of w along the diagonal (exact: zero blocks add 0.0)."""
    if pack == 1:
        return w
    r, c = w.shape
    out = jnp.zeros((pack * r, pack * c), w.dtype)
    for p in range(pack):
        out = out.at[p * r:(p + 1) * r, p * c:(p + 1) * c].set(w)
    return out


@functools.partial(
    jax.jit,
    static_argnames=("tm_max", "compute_dtype", "out_dtype", "approx_gelu"))
def feed_forward(x, w1, b1, w2, b2, *, tm_max=2048,
                 compute_dtype=jnp.bfloat16, out_dtype=None,
                 approx_gelu=False):
    """x: [N, dim] feature rows (VDBTensor jdata); returns [N, dim_out]."""
    N, dim = x.shape
    inner = w1.shape[1]
    dim_out = w2.shape[1]
    out_dtype = x.dtype if out_dtype is None else out_dtype

    # Lane-dense packing: `pack` tokens per 128-lane row when the dims allow.
    if dim == dim_out and dim < 128 and 128 % dim == 0:
        pack = 128 // dim
    else:
        pack = 1  # NOTE: correct but slow (masked 32-lane stores, K=dim MXU)

    rows = pl.cdiv(N, pack)

    # Only pad the <= (pack-1)-token tail so the packed reshape is exact; the
    # ragged last *tile* is handled by Pallas masking (grid = cdiv(rows, tm)).
    n_tail = rows * pack - N
    if n_tail:
        x = jnp.pad(x, ((0, n_tail), (0, 0)))
    x_packed = x.reshape(rows, pack * dim)   # no dtype cast here (in-kernel)

    # Tile: biggest multiple of 16 (bf16 sublane packing) that keeps >= 4 grid
    # steps (>= 2 per v7x TensorCore on the "parallel" axis), capped by tm_max.
    tm = min(tm_max, max(16, _round_up(pl.cdiv(rows, 4), 16)))
    grid = (pl.cdiv(rows, tm),)

    # Block-diagonal weights / lane-tiled biases (built once, tiny).
    w1_bd = _block_diag(w1, pack).astype(compute_dtype)
    w2_bd = _block_diag(w2, pack).astype(compute_dtype)
    b1_t = jnp.tile(b1.reshape(1, inner).astype(jnp.float32), (1, pack))
    b2_t = jnp.tile(b2.reshape(1, dim_out).astype(jnp.float32), (1, pack))

    kernel = functools.partial(_ffn_kernel, approx_gelu=approx_gelu)

    out_packed = pl.pallas_call(
        kernel,
        out_shape=jax.ShapeDtypeStruct((rows, pack * dim_out), out_dtype),
        grid_spec=pltpu.PrefetchScalarGridSpec(
            num_scalar_prefetch=0,
            grid=grid,
            in_specs=[
                pl.BlockSpec((tm, pack * dim), lambda i: (i, 0)),               # x tile
                pl.BlockSpec((pack * dim, pack * inner), lambda i: (0, 0)),     # W1 (resident)
                pl.BlockSpec((1, pack * inner), lambda i: (0, 0)),              # b1
                pl.BlockSpec((pack * inner, pack * dim_out), lambda i: (0, 0)), # W2 (resident)
                pl.BlockSpec((1, pack * dim_out), lambda i: (0, 0)),            # b2
            ],
            out_specs=pl.BlockSpec((tm, pack * dim_out), lambda i: (i, 0)),
        ),
        compiler_params=pltpu.CompilerParams(
            dimension_semantics=("parallel",),
            vmem_limit_bytes=48 * 1024 * 1024),
    )(x_packed, w1_bd, b1_t, w2_bd, b2_t)

    return out_packed.reshape(rows * pack, dim_out)[:N]


def init_params(key, dim, inner_dim, dim_out, dtype=jnp.float32):
    """Deterministic PyTorch-style (uniform +-1/sqrt(fan_in)) Linear init."""
    k1, k2, k3, k4 = jax.random.split(key, 4)
    lim1 = 1.0 / math.sqrt(dim)
    lim2 = 1.0 / math.sqrt(inner_dim)
    w1 = jax.random.uniform(k1, (dim, inner_dim), dtype, -lim1, lim1)
    b1 = jax.random.uniform(k2, (inner_dim,), dtype, -lim1, lim1)
    w2 = jax.random.uniform(k3, (inner_dim, dim_out), dtype, -lim2, lim2)
    b2 = jax.random.uniform(k4, (dim_out,), dtype, -lim2, lim2)
    return w1, b1, w2, b2


def feed_forward_ref(x, w1, b1, w2, b2):
    h = x @ w1 + b1.reshape(1, -1)
    h = 0.5 * h * (1.0 + jax.lax.erf(h * _INV_SQRT2))
    return h @ w2 + b2.reshape(1, -1)


if __name__ == "__main__":
    # Module config: FeedForward(dim=32, mult=4, glu=False, dropout=0.0)
    dim = 32
    mult = 4
    inner_dim = dim * mult          # 128
    dim_out = dim                   # default(dim_out, dim)
    N = 203                         # non multiple of pack AND of the tile

    key = jax.random.PRNGKey(0)
    kx, kp = jax.random.split(key)
    x = jax.random.normal(kx, (N, dim), jnp.float32)
    w1, b1, w2, b2 = init_params(kp, dim, inner_dim, dim_out)

    out = feed_forward(x, w1, b1, w2, b2)
    out = jax.block_until_ready(out)

    ref = feed_forward_ref(x, w1, b1, w2, b2)
    assert out.shape == (N, dim_out)
    # bf16 MXU operands (f32 accumulation) vs. the f32 reference -> loose tol.
    assert jnp.allclose(out, ref, atol=5e-2, rtol=5e-2), "mismatch vs reference"

    print("KERNEL_OK")
</pallas_src>

<mosaic_0001>
module attributes {stable_mosaic.version = 11 : i64} {
  func.func @_ffn_kernel(%arg0: i32, %arg1: memref<16x128xf32, #tpu.memory_space<vmem>>, %arg2: memref<128x512xbf16, #tpu.memory_space<vmem>>, %arg3: memref<1x512xf32, #tpu.memory_space<vmem>>, %arg4: memref<512x128xbf16, #tpu.memory_space<vmem>>, %arg5: memref<1x128xf32, #tpu.memory_space<vmem>>, %arg6: memref<16x128xf32, #tpu.memory_space<vmem>>) attributes {dimension_semantics = [#tpu.dimension_semantics<parallel>], iteration_bounds = array<i64: 4>, scalar_prefetch = 0 : i64, scratch_operands = 0 : i64, tpu.core_type = #tpu.core_type<tc>, window_params = [{transform_indices = @transform_0, window_bounds = array<i64: 16, 128>}, {pipeline_mode = #tpu.pipeline_mode<synchronous>, transform_indices = @transform_1, window_bounds = array<i64: 128, 512>}, {pipeline_mode = #tpu.pipeline_mode<synchronous>, transform_indices = @transform_2, window_bounds = array<i64: 1, 512>}, {pipeline_mode = #tpu.pipeline_mode<synchronous>, transform_indices = @transform_3, window_bounds = array<i64: 512, 128>}, {pipeline_mode = #tpu.pipeline_mode<synchronous>, transform_indices = @transform_4, window_bounds = array<i64: 1, 128>}, {transform_indices = @transform_5, window_bounds = array<i64: 16, 128>}]} {
    %c0 = arith.constant 0 : index
    %c0_0 = arith.constant 0 : index
    %0 = vector.load %arg1[%c0, %c0_0] : memref<16x128xf32, #tpu.memory_space<vmem>>, vector<16x128xf32>
    %1 = arith.truncf %0 : vector<16x128xf32> to vector<16x128xbf16>
    %c0_1 = arith.constant 0 : index
    %c0_2 = arith.constant 0 : index
    %2 = vector.load %arg2[%c0_1, %c0_2] : memref<128x512xbf16, #tpu.memory_space<vmem>>, vector<128x512xbf16>
    %cst = arith.constant dense<0.000000e+00> : vector<16x512xf32>
    %3 = tpu.matmul %1, %2, %cst {dimension_numbers = #tpu.dot_dimension_numbers<[1], [0], [0], [1], [0, 0, 1, 1], [], []>} : vector<16x128xbf16>, vector<128x512xbf16>, vector<16x512xf32> -> vector<16x512xf32>
    %c0_3 = arith.constant 0 : index
    %c0_4 = arith.constant 0 : index
    %4 = vector.load %arg3[%c0_3, %c0_4] : memref<1x512xf32, #tpu.memory_space<vmem>>, vector<1x512xf32>
    %5 = vector.broadcast %4 : vector<1x512xf32> to vector<16x512xf32>
    %6 = arith.addf %3, %5 : vector<16x512xf32>
    %cst_5 = arith.constant 5.000000e-01 : f32
    %7 = vector.broadcast %cst_5 : f32 to vector<16x512xf32>
    %8 = arith.mulf %7, %6 : vector<16x512xf32>
    %cst_6 = arith.constant 0.707106769 : f32
    %9 = vector.broadcast %cst_6 : f32 to vector<16x512xf32>
    %10 = arith.mulf %6, %9 : vector<16x512xf32>
    %11 = math.erf %10 : vector<16x512xf32>
    %cst_7 = arith.constant 1.000000e+00 : f32
    %12 = vector.broadcast %cst_7 : f32 to vector<16x512xf32>
    %13 = arith.addf %12, %11 : vector<16x512xf32>
    %14 = arith.mulf %8, %13 : vector<16x512xf32>
    %15 = arith.truncf %14 : vector<16x512xf32> to vector<16x512xbf16>
    %c0_8 = arith.constant 0 : index
    %c0_9 = arith.constant 0 : index
    %16 = vector.load %arg4[%c0_8, %c0_9] : memref<512x128xbf16, #tpu.memory_space<vmem>>, vector<512x128xbf16>
    %cst_10 = arith.constant dense<0.000000e+00> : vector<16x128xf32>
    %17 = tpu.matmul %15, %16, %cst_10 {dimension_numbers = #tpu.dot_dimension_numbers<[1], [0], [0], [1], [0, 0, 1, 1], [], []>} : vector<16x512xbf16>, vector<512x128xbf16>, vector<16x128xf32> -> vector<16x128xf32>
    %c0_11 = arith.constant 0 : index
    %c0_12 = arith.constant 0 : index
    %18 = vector.load %arg5[%c0_11, %c0_12] : memref<1x128xf32, #tpu.memory_space<vmem>>, vector<1x128xf32>
    %19 = vector.broadcast %18 : vector<1x128xf32> to vector<16x128xf32>
    %20 = arith.addf %17, %19 : vector<16x128xf32>
    %c0_13 = arith.constant 0 : index
    %c0_14 = arith.constant 0 : index
    %21 = vector.load %arg6[%c0_13, %c0_14] : memref<16x128xf32, #tpu.memory_space<vmem>>, vector<16x128xf32>
    tpu.vector_store %arg6[%c0_13, %c0_14], %20 {strides = array<i32>} : memref<16x128xf32, #tpu.memory_space<vmem>>, vector<16x128xf32>,
    return
  }
  func.func @transform_0(%arg0: i32) -> (i32, i32) {
    %c0_i32 = arith.constant 0 : i32
    %c0_i32_0 = arith.constant 0 : i32
    return %arg0, %c0_i32 : i32, i32
  }
  func.func @transform_1(%arg0: i32) -> (i32, i32) {
    %c0_i32 = arith.constant 0 : i32
    %c0_i32_0 = arith.constant 0 : i32
    %c0_i32_1 = arith.constant 0 : i32
    return %c0_i32, %c0_i32_0 : i32, i32
  }
  func.func @transform_2(%arg0: i32) -> (i32, i32) {
    %c0_i32 = arith.constant 0 : i32
    %c0_i32_0 = arith.constant 0 : i32
    %c0_i32_1 = arith.constant 0 : i32
    return %c0_i32, %c0_i32_0 : i32, i32
  }
  func.func @transform_3(%arg0: i32) -> (i32, i32) {
    %c0_i32 = arith.constant 0 : i32
    %c0_i32_0 = arith.constant 0 : i32
    %c0_i32_1 = arith.constant 0 : i32
    return %c0_i32, %c0_i32_0 : i32, i32
  }
  func.func @transform_4(%arg0: i32) -> (i32, i32) {
    %c0_i32 = arith.constant 0 : i32
    %c0_i32_0 = arith.constant 0 : i32
    %c0_i32_1 = arith.constant 0 : i32
    return %c0_i32, %c0_i32_0 : i32, i32
  }
  func.func @transform_5(%arg0: i32) -> (i32, i32) {
    %c0_i32 = arith.constant 0 : i32
    %c0_i32_0 = arith.constant 0 : i32
    return %arg0, %c0_i32 : i32, i32
  }
}

</mosaic_0001>

<bundles_post_ra>
// kernel: feed_forward.1
= control target key start
LH: loop header
LB: loop body
LE: loop exit
PB: predicated region body
PF: predicated region fallthrough
CT: control target
= control target key end

     0   :  { %s1979_s18 = smov 0   ;;  %s1981_s19 = smov 0   ;;  %s2713_s0 = inlined_call_operand.vmem [shape: f32[51,128], index: 0, kind: input, shape index: {}]   ;;  %s2714_s1 = inlined_call_operand.vmem [shape: bf16[128,512], index: 1, kind: input, shape index: {}]   ;;  %s2715_s2 = inlined_call_operand.vmem [shape: f32[1,512], index: 2, kind: input, shape index: {}]   ;;  %s2716_s3 = inlined_call_operand.vmem [shape: bf16[512,128], index: 3, kind: input, shape index: {}]   ;;  %s2717_s4 = inlined_call_operand.vmem [shape: f32[1,128], index: 4, kind: input, shape index: {}]   ;;  %s2718_s5 = inlined_call_operand.vmem [shape: f32[51,128], index: 5, kind: output, shape index: {}]  }
   0x1   :  { %s1983_s20 = smov 0  }
   0x2 LB: > { %s1992_s21 = sadd.s32 4294967295, %s1915_s20   ;;  %s1994_s22 = sadd.s32 1, %s1915_s20   ;;  %s1915_s20 = sphi %s1983_s20, %s2734_s20   ;;  %s1911_s19 = sphi %s1981_s19, %s2733_s19   ;;  %s1907_s18 = sphi %s1979_s18, %s2732_s18  }
   0x3   : > { %s129_s23 = ssub.s32 %s1915_s20, %s1994_s22  ;;  %s132_s24 = sadd.s32 1, %s1911_s19 }
   0x4   : > { %p130_p0 = scmp.eq.s32.totalorder %s129_s23, 0  ;;  %p142_p1 = scmp.ne.s32.totalorder %s1911_s19, %s1907_s18 }
   0x5   : > { %p143_p2 = scmp.eq.s32.totalorder %s1992_s21, 3  ;;  %p1404_p3 = scmp.ge.s32.totalorder %s1915_s20, 1 }
   0x6   : > { %s2002_s25 = scalar_select %p130_p0, %s1911_s19, %s132_s24  }
   0x7   : > { %p2004_p4 = por %p143_p2, %p142_p1  ;;  %p196_p5 = scmp.lt.s32.totalorder %s1915_s20, 5 }
   0x9   : > { %p197_p6 = pnand %p1404_p3, %p196_p5 }
   0xa   : > { %s2174_s17 = sshll.u32 (!%p197_p6), %s1992_s21, 1 }
   0xb   : > { %200 = sbr.rel (%p197_p6) target bundleno = 463 (0x1cf), region = 40  ;;  %p232_p7 = scmp.lt.s32.totalorder (!%p197_p6), %s2174_s17, 6 }
  0x10   : > { %v1522_v0 = vld [vmem:[%s2714_s1 + $0xe0] sm:$0xf]  ;;  %v1719_v1 = vld [vmem:[%s2714_s1 + $0xec] sm:$0xf0]  ;;  %v1717_v2 = vld [vmem:[%s2714_s1 + $0xe4] sm:$0xf] }
  0x11   : > { %v1523_v3 = vor.u32 %v1719_v1, %v1522_v0  ;;  %v1524_v4 = vld [vmem:[%s2714_s1 + $0xf0] sm:$0xf0]  ;;  %v1530_v5 = vld [vmem:[%s2714_s1 + $0xe8] sm:$0xf]  ;;  %v1720_v6 = vld [vmem:[%s2714_s1 + $0xf4] sm:$0xf0] }
  0x12   : > { %v1527_v7 = vor.u32 %v1717_v2, %v1524_v4  ;;  %v1531_v8 = vor.u32 %v1720_v6, %v1530_v5  ;;  %v1718_v9 = vld [vmem:[%s2714_s1 + $0xec] sm:$0xf]  ;;  %v1532_v10 = vld [vmem:[%s2714_s1 + $0xf8] sm:$0xf0]  ;;  %v1506_v11 = vld [vmem:[%s2714_s1 + $0xc0] sm:$0xf] }
  0x13   : > { %451 = vmatpush.bf16.msra.mxu0 %v1523_v3  ;;  %v1535_v12 = vor.u32 %v1718_v9, %v1532_v10  ;;  %v1715_v13 = vld [vmem:[%s2714_s1 + $0xcc] sm:$0xf0]  ;;  %v1713_v14 = vld [vmem:[%s2714_s1 + $0xc4] sm:$0xf]  ;;  %v1508_v15 = vld [vmem:[%s2714_s1 + $0xd0] sm:$0xf0] }
  0x14   : > { %465 = vmatpush.bf16.msra.mxu1 %v1527_v7  ;;  %479 = vmatpush.bf16.msra.mxu2 %v1531_v8  ;;  %v1507_v16 = vor.u32 %v1715_v13, %v1506_v11  ;;  %v1511_v17 = vor.u32 %v1713_v14, %v1508_v15  ;;  %v1514_v18 = vld [vmem:[%s2714_s1 + $0xc8] sm:$0xf]  ;;  %v1716_v19 = vld [vmem:[%s2714_s1 + $0xd4] sm:$0xf0]  ;;  %v1714_v20 = vld [vmem:[%s2714_s1 + $0xcc] sm:$0xf] }
  0x15   : > { %493 = vmatpush.bf16.msra.mxu3 %v1535_v12  ;;  %v1515_v21 = vor.u32 %v1716_v19, %v1514_v18  ;;  %v1516_v22 = vld [vmem:[%s2714_s1 + $0xd8] sm:$0xf0]  ;;  %v1490_v23 = vld [vmem:[%s2714_s1 + $0xa0] sm:$0xf]  ;;  %v1711_v24 = vld [vmem:[%s2714_s1 + $0xac] sm:$0xf0] }
  0x16   : > { %v1519_v25 = vor.u32 %v1714_v20, %v1516_v22  ;;  %v1709_v26 = vld [vmem:[%s2714_s1 + $0xa4] sm:$0xf]  ;;  %v1492_v27 = vld [vmem:[%s2714_s1 + $0xb0] sm:$0xf0]  ;;  %v1498_v28 = vld [vmem:[%s2714_s1 + $0xa8] sm:$0xf]  ;;  %v1491_v29 = vor.u32 %v1711_v24, %v1490_v23 }
  0x17   : > { %452 = vmatpush.bf16.msra.mxu0 %v1507_v16  ;;  %v1712_v30 = vld [vmem:[%s2714_s1 + $0xb4] sm:$0xf0]  ;;  %v1710_v31 = vld [vmem:[%s2714_s1 + $0xac] sm:$0xf]  ;;  %v1500_v32 = vld [vmem:[%s2714_s1 + $0xb8] sm:$0xf0]  ;;  %v1495_v33 = vor.u32 %v1709_v26, %v1492_v27 }
  0x18   : > { %466 = vmatpush.bf16.msra.mxu1 %v1511_v17  ;;  %480 = vmatpush.bf16.msra.mxu2 %v1515_v21  ;;  %v1499_v34 = vor.u32 %v1712_v30, %v1498_v28  ;;  %v1474_v35 = vld [vmem:[%s2714_s1 + $0x80] sm:$0xf]  ;;  %v1707_v36 = vld [vmem:[%s2714_s1 + $0x8c] sm:$0xf0]  ;;  %v1705_v37 = vld [vmem:[%s2714_s1 + $0x84] sm:$0xf]  ;;  %v1503_v38 = vor.u32 %v1710_v31, %v1500_v32 }
  0x19   : > { %494 = vmatpush.bf16.msra.mxu3 %v1519_v25  ;;  %v1476_v39 = vld [vmem:[%s2714_s1 + $0x90] sm:$0xf0]  ;;  %v1482_v40 = vld [vmem:[%s2714_s1 + $0x88] sm:$0xf]  ;;  %v1708_v41 = vld [vmem:[%s2714_s1 + $0x94] sm:$0xf0]  ;;  %v1475_v44 = vor.u32 %v1707_v36, %v1474_v35 }
  0x1a   : > { %v1706_v42 = vld [vmem:[%s2714_s1 + $0x8c] sm:$0xf]  ;;  %v1484_v43 = vld [vmem:[%s2714_s1 + $0x98] sm:$0xf0]  ;;  %v1479_v45 = vor.u32 %v1705_v37, %v1476_v39  ;;  %v1483_v46 = vor.u32 %v1708_v41, %v1482_v40  ;;  %v1458_v47 = vld [vmem:[%s2714_s1 + $0x60] sm:$0xf] }
  0x1b   : > { %453 = vmatpush.bf16.msra.mxu0 %v1491_v29  ;;  %v1703_v48 = vld [vmem:[%s2714_s1 + $0x6c] sm:$0xf0]  ;;  %v1701_v49 = vld [vmem:[%s2714_s1 + $0x64] sm:$0xf]  ;;  %v1487_v50 = vor.u32 %v1706_v42, %v1484_v43  ;;  %v1460_v51 = vld [vmem:[%s2714_s1 + $0x70] sm:$0xf0] }
  0x1c   : > { %467 = vmatpush.bf16.msra.mxu1 %v1495_v33  ;;  %481 = vmatpush.bf16.msra.mxu2 %v1499_v34  ;;  %v1466_v52 = vld [vmem:[%s2714_s1 + $0x68] sm:$0xf]  ;;  %v1704_v53 = vld [vmem:[%s2714_s1 + $0x74] sm:$0xf0]  ;;  %v1702_v54 = vld [vmem:[%s2714_s1 + $0x6c] sm:$0xf]  ;;  %v1459_v56 = vor.u32 %v1703_v48, %v1458_v47  ;;  %v1463_v57 = vor.u32 %v1701_v49, %v1460_v51 }
  0x1d   : > { %495 = vmatpush.bf16.msra.mxu3 %v1503_v38  ;;  %v1468_v55 = vld [vmem:[%s2714_s1 + $0x78] sm:$0xf0]  ;;  %v1467_v58 = vor.u32 %v1704_v53, %v1466_v52  ;;  %v1442_v59 = vld [vmem:[%s2714_s1 + $0x40] sm:$0xf]  ;;  %v1699_v60 = vld [vmem:[%s2714_s1 + $0x4c] sm:$0xf0] }
  0x1e   : > { %v1697_v61 = vld [vmem:[%s2714_s1 + $0x44] sm:$0xf]  ;;  %v1471_v62 = vor.u32 %v1702_v54, %v1468_v55  ;;  %v1444_v63 = vld [vmem:[%s2714_s1 + $0x50] sm:$0xf0]  ;;  %v1450_v0 = vld [vmem:[%s2714_s1 + $0x48] sm:$0xf]  ;;  %v1443_v4 = vor.u32 %v1699_v60, %v1442_v59 }
  0x1f   : > { %454 = vmatpush.bf16.msra.mxu0 %v1475_v44  ;;  %v1700_v1 = vld [vmem:[%s2714_s1 + $0x54] sm:$0xf0]  ;;  %v1698_v2 = vld [vmem:[%s2714_s1 + $0x4c] sm:$0xf]  ;;  %v1452_v3 = vld [vmem:[%s2714_s1 + $0x58] sm:$0xf0]  ;;  %v1447_v7 = vor.u32 %v1697_v61, %v1444_v63 }
  0x20   : > { %468 = vmatpush.bf16.msra.mxu1 %v1479_v45  ;;  %482 = vmatpush.bf16.msra.mxu2 %v1483_v46  ;;  %v1426_v5 = vld [vmem:[%s2714_s1 + $0x20] sm:$0xf]  ;;  %v1695_v6 = vld [vmem:[%s2714_s1 + $0x2c] sm:$0xf0]  ;;  %v1451_v8 = vor.u32 %v1700_v1, %v1450_v0  ;;  %v1693_v9 = vld [vmem:[%s2714_s1 + $0x24] sm:$0xf]  ;;  %v1455_v12 = vor.u32 %v1698_v2, %v1452_v3 }
  0x21   : > { %496 = vmatpush.bf16.msra.mxu3 %v1487_v50  ;;  %v1428_v10 = vld [vmem:[%s2714_s1 + $0x30] sm:$0xf0]  ;;  %v1434_v11 = vld [vmem:[%s2714_s1 + $0x28] sm:$0xf]  ;;  %v1696_v13 = vld [vmem:[%s2714_s1 + $0x34] sm:$0xf0]  ;;  %v1427_v16 = vor.u32 %v1695_v6, %v1426_v5 }
  0x22   : > { %v1694_v14 = vld [vmem:[%s2714_s1 + $0x2c] sm:$0xf]  ;;  %v1436_v15 = vld [vmem:[%s2714_s1 + $0x38] sm:$0xf0]  ;;  %v1410_v17 = vld [vmem:[%s2714_s1] sm:$0xf]  ;;  %v1431_v18 = vor.u32 %v1693_v9, %v1428_v10  ;;  %v1435_v19 = vor.u32 %v1696_v13, %v1434_v11 }
  0x23   : > { %455 = vmatpush.bf16.msra.mxu0 %v1459_v56  ;;  %v1691_v20 = vld [vmem:[%s2714_s1 + $0xc] sm:$0xf0]  ;;  %v1689_v21 = vld [vmem:[%s2714_s1 + $0x4] sm:$0xf]  ;;  %s233_s7 = scalar_select %p232_p7, %s2174_s17, 6  ;;  %v1439_v22 = vor.u32 %v1694_v14, %v1436_v15 }
  0x24   : > { %469 = vmatpush.bf16.msra.mxu1 %v1463_v57  ;;  %483 = vmatpush.bf16.msra.mxu2 %v1467_v58  ;;  %v1412_v23 = vld [vmem:[%s2714_s1 + $0x10] sm:$0xf0]  ;;  %v1418_v24 = vld [vmem:[%s2714_s1 + $0x8] sm:$0xf]  ;;  %v1692_v25 = vld [vmem:[%s2714_s1 + $0x14] sm:$0xf0]  ;;  %v1411_v28 = vor.u32 %v1691_v20, %v1410_v17 }
  0x25   : > { %497 = vmatpush.bf16.msra.mxu3 %v1471_v62  ;;  %v1690_v26 = vld [vmem:[%s2714_s1 + $0xc] sm:$0xf]  ;;  %v1420_v27 = vld [vmem:[%s2714_s1 + $0x18] sm:$0xf0]  ;;  %s1407_s23 = sshll.u32 %s233_s7, 3  ;;  %v1415_v29 = vor.u32 %v1689_v21, %v1412_v23  ;;  %v1419_v30 = vor.u32 %v1692_v25, %v1418_v24 }
  0x26   : > { %s235_s28 = scalar_lea.vmem %s2713_s0, %s1407_s23  ;;  %v1423_v33 = vor.u32 %v1690_v26, %v1420_v27  ;;  %v2211_v35 = vld [vmem:[%s2715_s2] sm:$0xf]  ;;  %s224_s23 = sand.u32 1, %s1907_s18  }
  0x27   : > { %456 = vmatpush.bf16.msra.mxu0 %v1443_v4  ;;  %v246_v31 = vld [vmem:[%s235_s28] sm:$0xff]  ;;  %v247_v32 = vld [vmem:[%s235_s28 + $0x8] sm:$0xff]  ;;  %v283_v36 = vperm.slane %v2211_v35, 0  ;;  %v284_v37 = vperm.slane %v2211_v35, 1  ;;  %v285_v44 = vperm.slane %v2211_v35, 2  ;;  %v286_v54 = vperm.slane %v2211_v35, 3 }
  0x28   : > { %470 = vmatpush.bf16.msra.mxu1 %v1447_v7  ;;  %484 = vmatpush.bf16.msra.mxu2 %v1451_v8  ;;  %v248_v34 = vpack.c.bf16 %v247_v32, %v246_v31  ;;  %s1405_s24 = sshll.u32 %s224_s23, 4  ;;  %s1189_s18 = ssub.s32 (%p2004_p4), 7, %s2174_s17 }
  0x29   : > { %498 = vmatpush.bf16.msra.mxu3 %v1455_v12  ;;  %s2668_s27 = scalar_lea.vmem [#allocation2], %s1405_s24   ;;  %s1753_s28 = sshll.u32 (%p2004_p4), %s1992_s21, 4 }
  0x2a   : > { %p1190_p8 = scmp.lt.s32.totalorder (%p2004_p4), %s1189_s18, 2  ;;  %s2679_s6 = scalar_lea.vmem (%p2004_p4), %s2718_s5, %s1753_s28  }
  0x2b   : > { %457 = vmatpush.bf16.msra.mxu0 %v1427_v16 }
  0x2c   : > { %471 = vmatpush.bf16.msra.mxu1 %v1431_v18  ;;  %485 = vmatpush.bf16.msra.mxu2 %v1435_v19 }
  0x2d   : > { %499 = vmatpush.bf16.msra.mxu3 %v1439_v22 }
  0x2f   : > { %458 = vmatpush.bf16.msra.mxu0 %v1411_v28 }
  0x30   : > { %472 = vmatpush.bf16.msra.mxu1 %v1415_v29  ;;  %486 = vmatpush.bf16.msra.mxu2 %v1419_v30 }
  0x31   : > { %500 = vmatpush.bf16.msra.mxu3 %v1423_v33 }
  0x32   : > { %459 = vmatmul.bf16.vlgmr.msra.gmra.mxu0 %v248_v34 }
  0x33   : > { %473 = vmatmul.bf16.vlgmr.msra.gmra.mxu1 %v248_v34  ;;  %487 = vmatmul.bf16.vlgmr.msra.gmra.mxu2 %v248_v34 }
  0x34   : > { %501 = vmatmul.bf16.vlgmr.msra.gmra.mxu3 %v248_v34 }
  0xaf   : > { %v460_v38 = vpop.f32.mrf.mxu0 }
  0xb0   : > { %v2215_v39 = vadd.f32 %v460_v38, %v283_v36  ;;  %v474_v40 = vpop.f32.mrf.mxu1 }
  0xb1   : > { %v2219_v41 = vadd.f32 %v474_v40, %v284_v37 }
  0xb2   : > { %v2222_v42 = vmul.f32 0.70710677, %v2215_v39 }
  0xb3   : > { %v2225_v43 = vmul.f32 0.70710677, %v2219_v41 }
  0xb4   : > { %v523_v45 = vmul.f32 %v2222_v42, %v2222_v42 }
  0xb5   : > { %v563_v46 = vmul.f32 %v2225_v43, %v2225_v43 }
  0xb6   : > { %v2232_v47 = vmin.f32 %v523_v45, 16.0  ;;  %v488_v48 = vpop.f32.mrf.mxu2 }
  0xb7   : > { %v2234_v49 = vmin.f32 %v563_v46, 16.0  ;;  %v2238_v50 = vadd.f32 %v488_v48, %v285_v44  ;;  %v502_v57 = vpop.f32.mrf.mxu3  ;;  %v462_v1 = vpop.f32.mrf.mxu0 }
  0xb8   : > { %v536_v51 = vmul.f32 3.8918573e-05, %v2232_v47  ;;  %v525_v52 = vmul.f32 2.1237322e-06, %v2232_v47  ;;  %v2254_v0 = vadd.f32 %v502_v57, %v286_v54  ;;  %v2259_v7 = vadd.f32 %v462_v1, %v283_v36  ;;  %v476_v29 = vpop.f32.mrf.mxu1 }
  0xb9   : > { %v576_v53 = vmul.f32 3.8918573e-05, %v2234_v49  ;;  %v2245_v56 = vmul.f32 0.70710677, %v2238_v50  ;;  %v565_v60 = vmul.f32 2.1237322e-06, %v2234_v49  ;;  %v477_v40 = vadd.f32 %v476_v29, %v284_v37 }
  0xba   : > { %v537_v55 = vadd.f32 0.001143296, %v536_v51  ;;  %v526_v62 = vadd.f32 0.00028619796, %v525_v52  ;;  %v2264_v10 = vmul.f32 0.70710677, %v2254_v0 }
  0xbb   : > { %v577_v58 = vadd.f32 0.001143296, %v576_v53  ;;  %v603_v61 = vmul.f32 %v2245_v56, %v2245_v56  ;;  %v566_v6 = vadd.f32 0.00028619796, %v565_v60  ;;  %v2270_v16 = vmul.f32 0.70710677, %v2259_v7 }
  0xbc   : > { %v538_v59 = vmul.f32 %v537_v55, %v2232_v47  ;;  %v527_v8 = vmul.f32 %v526_v62, %v2232_v47  ;;  %v643_v18 = vmul.f32 %v2264_v10, %v2264_v10  ;;  %v2321_v29 = vmul.f32 0.5, %v2215_v39 }
  0xbd   : > { %v578_v63 = vmul.f32 %v577_v58, %v2234_v49  ;;  %v2256_v3 = vmin.f32 %v603_v61, 16.0  ;;  %v567_v14 = vmul.f32 %v566_v6, %v2234_v49  ;;  %v683_v24 = vmul.f32 %v2270_v16, %v2270_v16 }
  0xbe   : > { %v539_v2 = vadd.f32 0.014752088, %v538_v59  ;;  %v528_v17 = vadd.f32 0.0036580483, %v527_v8  ;;  %v2279_v26 = vmin.f32 %v643_v18, 16.0  ;;  %v2335_v39 = vmul.f32 0.5, %v477_v40 }
  0xbf   : > { %v579_v4 = vadd.f32 0.014752088, %v578_v63  ;;  %v616_v12 = vmul.f32 3.8918573e-05, %v2256_v3  ;;  %v568_v22 = vadd.f32 0.0036580483, %v567_v14 }
  0xc0   : > { %v540_v5 = vmul.f32 %v539_v2, %v2232_v47  ;;  %v529_v25 = vmul.f32 %v528_v17, %v2232_v47  ;;  %v605_v32 = vmul.f32 2.1237322e-06, %v2256_v3  ;;  %v2286_v33 = vmin.f32 %v683_v24, 16.0 }
  0xc1   : > { %v580_v9 = vmul.f32 %v579_v4, %v2234_v49  ;;  %v617_v20 = vadd.f32 0.001143296, %v616_v12  ;;  %v569_v30 = vmul.f32 %v568_v22, %v2234_v49  ;;  %v656_v36 = vmul.f32 3.8918573e-05, %v2279_v26 }
  0xc2   : > { %v541_v11 = vadd.f32 0.112945676, %v540_v5  ;;  %v530_v34 = vadd.f32 0.05243302, %v529_v25  ;;  %v606_v48 = vadd.f32 0.00028619796, %v605_v32  ;;  %v490_v25 = vpop.f32.mrf.mxu2 }
  0xc3   : > { %v581_v15 = vadd.f32 0.112945676, %v580_v9  ;;  %v618_v27 = vmul.f32 %v617_v20, %v2256_v3  ;;  %v570_v45 = vadd.f32 0.05243302, %v569_v30  ;;  %v685_v51 = vmul.f32 2.1237322e-06, %v2286_v33 }
  0xc4   : > { %v542_v13 = vmul.f32 %v541_v11, %v2232_v47  ;;  %v531_v52 = vmul.f32 %v530_v34, %v2232_v47  ;;  %v657_v53 = vadd.f32 0.001143296, %v656_v36  ;;  %v696_v57 = vmul.f32 3.8918573e-05, %v2286_v33 }
  0xc5   : > { %v582_v23 = vmul.f32 %v581_v15, %v2234_v49  ;;  %v619_v38 = vadd.f32 0.014752088, %v618_v27  ;;  %v2297_v58 = vmul.f32 0.70710677, %v477_v40  ;;  %v686_v59 = vadd.f32 0.00028619796, %v685_v51  ;;  %v504_v27 = vpop.f32.mrf.mxu3 }
  0xc6   : > { %v543_v19 = vadd.f32 0.4994258, %v542_v13  ;;  %v571_v37 = vmul.f32 %v570_v45, %v2234_v49  ;;  %v607_v61 = vmul.f32 %v606_v48, %v2256_v3  ;;  %v532_v63 = vadd.f32 0.18741608, %v531_v52 }
  0xc7   : > { %v583_v31 = vadd.f32 0.4994258, %v582_v23  ;;  %v620_v55 = vmul.f32 %v619_v38, %v2256_v3  ;;  %v658_v1 = vmul.f32 %v657_v53, %v2279_v26  ;;  %v697_v4 = vadd.f32 0.001143296, %v696_v57 }
  0xc8   : > { %v544_v21 = vmul.f32 %v543_v19, %v2232_v47  ;;  %v723_v5 = vmul.f32 %v2297_v58, %v2297_v58  ;;  %v645_v6 = vmul.f32 2.1237322e-06, %v2279_v26  ;;  %v687_v8 = vmul.f32 %v686_v59, %v2286_v33  ;;  %v1728_v59 = vld [vmem:[%s2716_s3 + $0x38] sm:$0xff] }
  0xc9   : > { %v584_v46 = vmul.f32 %v583_v31, %v2234_v49  ;;  %v621_v2 = vadd.f32 0.112945676, %v620_v55  ;;  %v572_v11 = vadd.f32 0.18741608, %v571_v37  ;;  %v608_v12 = vadd.f32 0.0036580483, %v607_v61  ;;  %1123 = vmatpush.bf16.msrb.mxu0 %v1728_v59 }
  0xca   : > { %v2282_v28 = vadd.f32 1.0, %v544_v21  ;;  %v533_v13 = vmul.f32 %v532_v63, %v2232_v47  ;;  %v659_v14 = vadd.f32 0.014752088, %v658_v1  ;;  %v698_v15 = vmul.f32 %v697_v4, %v2286_v33 }
  0xcb   : > { %v2300_v60 = vadd.f32 1.0, %v584_v46  ;;  %v622_v17 = vmul.f32 %v621_v2, %v2256_v3  ;;  %v2316_v18 = vmin.f32 %v723_v5, 16.0  ;;  %v688_v19 = vadd.f32 0.0036580483, %v687_v8 }
  0xcc   : > { %1845 = vrcp.f32 %v2282_v28  ;;  %v699_v20 = vadd.f32 0.014752088, %v698_v15  ;;  %v573_v22 = vmul.f32 %v572_v11, %v2234_v49  ;;  %v609_v23 = vmul.f32 %v608_v12, %v2256_v3 }
  0xcd   : > { %1847 = vrcp.f32 %v2300_v60  ;;  %v646_v24 = vadd.f32 0.00028619796, %v645_v6  ;;  %v534_v47 = vadd.f32 1.1283791, %v533_v13  ;;  %v660_v30 = vmul.f32 %v659_v14, %v2279_v26 }
  0xce   : > { %v700_v31 = vmul.f32 %v699_v20, %v2286_v33  ;;  %v2328_v34 = vmul.f32 0.5, %v2219_v41  ;;  %v623_v36 = vadd.f32 0.4994258, %v622_v17  ;;  %v2331_v49 = vmul.f32 0.5, %v2259_v7  ;;  %v1727_v17 = vld [vmem:[%s2716_s3 + $0x30] sm:$0xff] }
  0xcf   : > { %v725_v38 = vmul.f32 2.1237322e-06, %v2316_v18  ;;  %v689_v45 = vmul.f32 %v688_v19, %v2286_v33  ;;  %v2339_v46 = vadd.f32 %v490_v25, %v285_v44  ;;  %v2343_v48 = vadd.f32 %v504_v27, %v286_v54  ;;  %v1735_v19 = vld [vmem:[%s2716_s3 + $0x70] sm:$0xff]  ;;  %v1752_v25 = vld [vmem:[%s2716_s3 + $0xf8] sm:$0xff]  ;;  %1124 = vmatpush.bf16.msrb.mxu0 %v1727_v17  ;;  %v1742_v17 = vld [vmem:[%s2716_s3 + $0xa8] sm:$0xff] }
  0xd0   : > { %v574_v51 = vadd.f32 1.1283791, %v573_v22  ;;  %v610_v52 = vadd.f32 0.05243302, %v609_v23  ;;  %v647_v7 = vmul.f32 %v646_v24, %v2279_v26  ;;  %v2348_v53 = vmul.f32 %v534_v47, %v2222_v42  ;;  %v1736_v42 = vld [vmem:[%s2716_s3 + $0x78] sm:$0xff]  ;;  %1165 = vmatpush.bf16.msrb.mxu3 %v1752_v25 }
  0xd1   : > { %v661_v55 = vadd.f32 0.112945676, %v660_v30  ;;  %v701_v57 = vadd.f32 0.112945676, %v700_v31  ;;  %vm551_vm0 = vweird.f32 %v2282_v28  ;;  %v555_v35 = vand.u32 2147483647, %v2282_v28  ;;  %1137 = vmatpush.bf16.msrb.mxu1 %v1736_v42 }
  0xd2   : > { %v2303_v62 = vpop.eup %1845  ;;  %v624_v44 = vmul.f32 %v623_v36, %v2256_v3  ;;  %v726_v54 = vadd.f32 0.00028619796, %v725_v38  ;;  %v557_v37 = vand.u32 2147483648, %v2282_v28  ;;  %v690_v61 = vadd.f32 0.05243302, %v689_v45  ;;  %v1744_v24 = vld [vmem:[%s2716_s3 + $0xb8] sm:$0xff] }
  0xd3   : > { %v547_v9 = vmul.f32 %v2303_v62, %v2282_v28  ;;  %v2325_v32 = vpop.eup %1847  ;;  %v702_v63 = vmul.f32 %v701_v57, %v2286_v33  ;;  %v736_v1 = vmul.f32 3.8918573e-05, %v2316_v18  ;;  %vm552_vm1 = vweird.f32 %v2303_v62  ;;  %1151 = vmatpush.bf16.msrb.mxu2 %v1744_v24  ;;  %v1743_v57 = vld [vmem:[%s2716_s3 + $0xb0] sm:$0xff] }
  0xd4   : > { %v587_v40 = vmul.f32 %v2325_v32, %v2300_v60  ;;  %v611_v4 = vmul.f32 %v610_v52, %v2256_v3  ;;  %v2368_v5 = vmul.f32 0.70710677, %v2339_v46  ;;  %v662_v8 = vmul.f32 %v661_v55, %v2279_v26  ;;  %vm2388_vm2 = vmor %vm551_vm0, %vm552_vm1  ;;  %v1734_v52 = vld [vmem:[%s2716_s3 + $0x68] sm:$0xff] }
  0xd5   : > { %v548_v21 = vsub.f32 1.0, %v547_v9  ;;  %v703_v9 = vadd.f32 0.4994258, %v702_v63  ;;  %v737_v11 = vadd.f32 0.001143296, %v736_v1  ;;  %v2372_v12 = vmul.f32 %v574_v51, %v2225_v43  ;;  %1138 = vmatpush.bf16.msrb.mxu1 %v1735_v19  ;;  %v1726_v51 = vld [vmem:[%s2716_s3 + $0x28] sm:$0xff] }
  0xd6   : > { %v588_v6 = vsub.f32 1.0, %v587_v40  ;;  %v595_v13 = vand.u32 2147483647, %v2300_v60  ;;  %v2375_v14 = vadd.f32 1.0, %v624_v44  ;;  %v727_v15 = vmul.f32 %v726_v54, %v2316_v18  ;;  %1125 = vmatpush.bf16.msrb.mxu0 %v1726_v51  ;;  %v1750_v19 = vld [vmem:[%s2716_s3 + $0xe8] sm:$0xff] }
  0xd7   : > { %v549_v41 = vmul.f32 %v2303_v62, %v548_v21  ;;  %v558_v20 = vor.u32 1.1754944e-38, %v557_v37  ;;  %v691_v21 = vmul.f32 %v690_v61, %v2286_v33  ;;  %v704_v22 = vmul.f32 %v703_v9, %v2286_v33  ;;  %1152 = vmatpush.bf16.msrb.mxu2 %v1743_v57 }
  0xd8   : > { %v738_v23 = vmul.f32 %v737_v11, %v2316_v18  ;;  %v612_v27 = vadd.f32 0.18741608, %v611_v4  ;;  %v648_v47 = vadd.f32 0.0036580483, %v647_v7  ;;  %v763_v30 = vmul.f32 %v2368_v5, %v2368_v5 }
  0xd9   : > { %v550_v2 = vadd.f32 %v2303_v62, %v549_v41  ;;  %v589_v31 = vmul.f32 %v2325_v32, %v588_v6  ;;  %v663_v36 = vadd.f32 0.4994258, %v662_v8  ;;  %v2407_v38 = vadd.f32 1.0, %v704_v22  ;;  %1139 = vmatpush.bf16.msrb.mxu1 %v1734_v52  ;;  %v1725_v6 = vld [vmem:[%s2716_s3 + $0x20] sm:$0xff] }
  0xda   : > { %v739_v45 = vadd.f32 0.014752088, %v738_v23  ;;  %vm556_vm3 = vcmp.eq.f32.partialorder %v555_v35, 8.507059e+37  ;;  %1849 = vrcp.f32 %v2375_v14  ;;  %v728_v41 = vadd.f32 0.0036580483, %v727_v15  ;;  %v1751_v35 = vld [vmem:[%s2716_s3 + $0xf0] sm:$0xff]  ;;  %1126 = vmatpush.bf16.msrb.mxu0 %v1725_v6 }
  0xdb   : > { %v554_v28 = vsel %vm2388_vm2, %v2303_v62, %v550_v2  ;;  %v2410_v62 = vmin.f32 %v763_v30, 16.0  ;;  %v692_v40 = vadd.f32 0.18741608, %v691_v21  ;;  %1851 = vrcp.f32 %v2407_v38  ;;  %1166 = vmatpush.bf16.msrb.mxu3 %v1751_v35  ;;  %v1733_v8 = vld [vmem:[%s2716_s3 + $0x60] sm:$0xff]  ;;  %1153 = vmatpush.bf16.msrb.mxu2 %v1742_v17 }
  0xdc   : > { %v559_v7 = vsel %vm556_vm3, %v558_v20, %v554_v28  ;;  %v2420_v55 = vmul.f32 0.70710677, %v2343_v48  ;;  %v597_v44 = vand.u32 2147483648, %v2300_v60  ;;  %v613_v54 = vmul.f32 %v612_v27, %v2256_v3  ;;  %v1724_v27 = vld [vmem:[%s2716_s3 + $0x18] sm:$0xff] }
  0xdd   : > { %v649_v59 = vmul.f32 %v648_v47, %v2279_v26  ;;  %v740_v42 = vmul.f32 %v739_v45, %v2316_v18  ;;  %v2433_v37 = vadd.f32 %v2325_v32, %v589_v31  ;;  %vm592_vm4 = vweird.f32 %v2325_v32  ;;  %1140 = vmatpush.bf16.msrb.mxu1 %v1733_v8  ;;  %v1732_v47 = vld [vmem:[%s2716_s3 + $0x58] sm:$0xff] }
  0xde   : > { %v765_v61 = vmul.f32 2.1237322e-06, %v2410_v62  ;;  %v776_v63 = vmul.f32 3.8918573e-05, %v2410_v62  ;;  %v2439_v1 = vmul.f32 %v559_v7, %v2348_v53  ;;  %v664_v3 = vmul.f32 %v663_v36, %v2279_v26  ;;  %1127 = vmatpush.bf16.msrb.mxu0 %v1724_v27  ;;  %v1730_v27 = vld [vmem:[%s2716_s3 + $0x48] sm:$0xff] }
  0xdf   : > { %v729_v2 = vmul.f32 %v728_v41, %v2316_v18  ;;  %v741_v4 = vadd.f32 0.112945676, %v740_v42  ;;  %v693_v9 = vmul.f32 %v692_v40, %v2286_v33  ;;  %v803_v53 = vmul.f32 %v2420_v55, %v2420_v55  ;;  %1167 = vmatpush.bf16.msrb.mxu3 %v1750_v19  ;;  %v1748_v19 = vld [vmem:[%s2716_s3 + $0xd8] sm:$0xff] }
  0xe0   : > { %v766_v11 = vadd.f32 0.00028619796, %v765_v61  ;;  %v777_v15 = vadd.f32 0.001143296, %v776_v63  ;;  %v2458_v43 = vpop.eup %1849  ;;  %vm591_vm5 = vweird.f32 %v2300_v60  ;;  %v2461_v20 = vor.u32 1.1754944e-38, %v597_v44  ;;  %v1741_v60 = vld [vmem:[%s2716_s3 + $0xa0] sm:$0xff] }
  0xe1   : > { %v2463_v33 = vadd.f32 0.05243302, %v649_v59  ;;  %v742_v21 = vmul.f32 %v741_v4, %v2316_v18  ;;  %v2466_v22 = vpop.eup %1851  ;;  %v2468_v23 = vadd.f32 1.1283791, %v613_v54  ;;  %v2472_v28 = vmin.f32 %v803_v53, 16.0  ;;  %vm2485_vm6 = vmor %vm591_vm5, %vm592_vm4  ;;  %1141 = vmatpush.bf16.msrb.mxu1 %v1732_v47  ;;  %v1723_v63 = vld [vmem:[%s2716_s3 + $0x10] sm:$0xff]  ;;  %1154 = vmatpush.bf16.msrb.mxu2 %v1741_v60 }
  0xe2   : > { %v767_v24 = vmul.f32 %v766_v11, %v2410_v62  ;;  %v778_v25 = vmul.f32 %v777_v15, %v2410_v62  ;;  %v1536_v30 = vclamps-f32 %v2439_v1, 1.0  ;;  %v2489_v36 = vadd.f32 1.0, %v664_v3  ;;  %v1731_v1 = vld [vmem:[%s2716_s3 + $0x50] sm:$0xff]  ;;  %v1740_v11 = vld [vmem:[%s2716_s3 + $0x98] sm:$0xff]  ;;  %1128 = vmatpush.bf16.msrb.mxu0 %v1723_v63 }
  0xe3   : > { %v707_v45 = vmul.f32 %v2466_v22, %v2407_v38  ;;  %v730_v41 = vadd.f32 0.05243302, %v729_v2  ;;  %v594_v51 = vsel %vm2485_vm6, %v2325_v32, %v2433_v37  ;;  %vm2499_vm7 = vcmp.eq.f32.partialorder %v595_v13, 8.507059e+37  ;;  %v1749_v32 = vld [vmem:[%s2716_s3 + $0xe0] sm:$0xff] }
  0xe4   : > { %v694_v7 = vadd.f32 1.1283791, %v693_v9  ;;  %v743_v40 = vadd.f32 0.4994258, %v742_v21  ;;  %v779_v57 = vadd.f32 0.014752088, %v778_v25  ;;  %v2505_v35 = vmul.f32 %v2458_v43, %v2375_v14  ;;  %1168 = vmatpush.bf16.msrb.mxu3 %v1749_v32 }
  0xe5   : > { %v708_v44 = vsub.f32 1.0, %v707_v45  ;;  %v717_v54 = vand.u32 2147483648, %v2407_v38  ;;  %v805_v59 = vmul.f32 2.1237322e-06, %v2472_v28  ;;  %v768_v42 = vadd.f32 0.0036580483, %v767_v24  ;;  %1142 = vmatpush.bf16.msrb.mxu1 %v1731_v1  ;;  %1155 = vmatpush.bf16.msrb.mxu2 %v1740_v11 }
  0xe6   : > { %v744_v13 = vmul.f32 %v743_v40, %v2316_v18  ;;  %v780_v37 = vmul.f32 %v779_v57, %v2410_v62  ;;  %v816_v61 = vmul.f32 3.8918573e-05, %v2472_v28  ;;  %vm712_vm8 = vweird.f32 %v2466_v22  ;;  %v1739_v57 = vld [vmem:[%s2716_s3 + $0x90] sm:$0xff] }
  0xe7   : > { %v709_v3 = vmul.f32 %v2466_v22, %v708_v44  ;;  %v715_v2 = vand.u32 2147483647, %v2407_v38  ;;  %v731_v4 = vmul.f32 %v730_v41, %v2316_v18  ;;  %1853 = vrcp.f32 %v2489_v36 }
  0xe8   : > { %v2529_v6 = vadd.f32 1.0, %v744_v13  ;;  %v781_v8 = vadd.f32 0.112945676, %v780_v37  ;;  %v806_v9 = vadd.f32 0.00028619796, %v805_v59  ;;  %v628_v15 = vsub.f32 1.0, %v2505_v35  ;;  %1169 = vmatpush.bf16.msrb.mxu3 %v1748_v19 }
  0xe9   : > { %v710_v53 = vadd.f32 %v2466_v22, %v709_v3  ;;  %vm711_vm9 = vweird.f32 %v2407_v38  ;;  %v817_v17 = vadd.f32 0.001143296, %v816_v61  ;;  %v695_v21 = vmul.f32 %v694_v7, %v2270_v16  ;;  %v1722_v38 = vld [vmem:[%s2716_s3 + $0x8] sm:$0xff]  ;;  %1143 = vmatpush.bf16.msrb.mxu1 %v1730_v27  ;;  %1156 = vmatpush.bf16.msrb.mxu2 %v1739_v57 }
  0xea   : > { %vm713_vm10 = vmor %vm711_vm9, %vm712_vm8  ;;  %v718_v24 = vor.u32 1.1754944e-38, %v717_v54  ;;  %1855 = vrcp.f32 %v2529_v6  ;;  %v769_v25 = vmul.f32 %v768_v42, %v2410_v62  ;;  %vm716_vm11 = vcmp.eq.f32.partialorder %v715_v2, 8.507059e+37  ;;  %1129 = vmatpush.bf16.msrb.mxu0 %v1722_v38 }
  0xeb   : > { %v714_v47 = vsel %vm713_vm10, %v2466_v22, %v710_v53  ;;  %v732_v16 = vadd.f32 0.18741608, %v731_v4  ;;  %v782_v31 = vmul.f32 %v781_v8, %v2410_v62  ;;  %v635_v45 = vand.u32 2147483647, %v2375_v14  ;;  %v1747_v22 = vld [vmem:[%s2716_s3 + $0xd0] sm:$0xff]  ;;  %v1738_v4 = vld [vmem:[%s2716_s3 + $0x88] sm:$0xff] }
  0xec   : > { %v719_v41 = vsel %vm716_vm11, %v718_v24, %v714_v47  ;;  %v807_v7 = vmul.f32 %v806_v9, %v2472_v28  ;;  %v818_v40 = vmul.f32 %v817_v17, %v2472_v28  ;;  %v843_v35 = vadd.f32 1.0, %v1536_v30  ;;  %v1721_v30 = vld [vmem:[%s2716_s3] sm:$0xff]  ;;  %1170 = vmatpush.bf16.msrb.mxu3 %v1747_v22 }
  0xed   : > { %v599_v44 = vsel %vm2499_vm7, %v2461_v20, %v594_v51  ;;  %v720_v54 = vmul.f32 %v719_v41, %v695_v21  ;;  %v783_v59 = vadd.f32 0.4994258, %v782_v31  ;;  %v2565_v60 = vpop.eup %1853  ;;  %vm631_vm12 = vweird.f32 %v2375_v14  ;;  %v1729_v20 = vld [vmem:[%s2716_s3 + $0x40] sm:$0xff]  ;;  %1157 = vmatpush.bf16.msrb.mxu2 %v1738_v4 }
  0xee   : > { %v651_v32 = vmul.f32 %v2463_v33, %v2279_v26  ;;  %v770_v13 = vadd.f32 0.05243302, %v769_v25  ;;  %v819_v42 = vadd.f32 0.014752088, %v818_v40  ;;  %v629_v51 = vmul.f32 %v2458_v43, %v628_v15  ;;  %1130 = vmatpush.bf16.msrb.mxu0 %v1721_v30  ;;  %1144 = vmatpush.bf16.msrb.mxu1 %v1729_v20  ;;  %v1737_v47 = vld [vmem:[%s2716_s3 + $0x80] sm:$0xff] }
  0xef   : > { %v1540_v52 = vclamps-f32 %v720_v54, 1.0  ;;  %v733_v37 = vmul.f32 %v732_v16, %v2316_v18  ;;  %v784_v61 = vmul.f32 %v783_v59, %v2410_v62  ;;  %v600_v63 = vmul.f32 %v599_v44, %v2372_v12  ;;  %v1746_v18 = vld [vmem:[%s2716_s3 + $0xc8] sm:$0xff] }
  0xf0   : > { %v1856_v33 = vpop.eup %1855  ;;  %v637_v1 = vand.u32 2147483648, %v2375_v14  ;;  %v808_v3 = vadd.f32 0.0036580483, %v807_v7  ;;  %v820_v2 = vmul.f32 %v819_v42, %v2472_v28  ;;  %v851_v8 = vmul.f32 %v843_v35, %v2321_v29  ;;  %1171 = vmatpush.bf16.msrb.mxu3 %v1746_v18 }
  0xf1   : > { %vm632_vm13 = vweird.f32 %v2458_v43  ;;  %v847_v9 = vadd.f32 1.0, %v1540_v52  ;;  %v747_v12 = vmul.f32 %v1856_v33, %v2529_v6  ;;  %v667_v11 = vmul.f32 %v2565_v60, %v2489_v36  ;;  %1158 = vmatpush.bf16.msrb.mxu2 %v1737_v47 }
  0xf2   : > { %v771_v15 = vmul.f32 %v770_v13, %v2410_v62  ;;  %v2594_v53 = vadd.f32 1.0, %v784_v61  ;;  %v821_v17 = vadd.f32 0.112945676, %v820_v2  ;;  %v630_v19 = vadd.f32 %v2458_v43, %v629_v51  ;;  %vm2613_vm15 = vmor %vm631_vm12, %vm632_vm13 }
  0xf3   : > { %v855_v21 = vmul.f32 %v847_v9, %v2331_v49  ;;  %v734_v29 = vadd.f32 1.1283791, %v733_v37  ;;  %v748_v24 = vsub.f32 1.0, %v747_v12  ;;  %v755_v25 = vand.u32 2147483647, %v2529_v6  ;;  %v1745_v49 = vld [vmem:[%s2716_s3 + $0xc0] sm:$0xff] }
  0xf4   : > { %v757_v38 = vand.u32 2147483648, %v2529_v6  ;;  %1857 = vrcp.f32 %v2594_v53  ;;  %v809_v27 = vmul.f32 %v808_v3, %v2472_v28  ;;  %vm752_vm14 = vweird.f32 %v1856_v33  ;;  %1172 = vmatpush.bf16.msrb.mxu3 %v1745_v49 }
  0xf5   : > { %v749_v16 = vmul.f32 %v1856_v33, %v748_v24  ;;  %v822_v31 = vmul.f32 %v821_v17, %v2472_v28  ;;  %v859_v41 = vpack.c.bf16 %v855_v21, %v851_v8  ;;  %vm2617_vm0 = vcmp.eq.f32.partialorder %v635_v45, 8.507059e+37 }
  0xf6   : > { %v652_v57 = vadd.f32 0.18741608, %v651_v32  ;;  %v668_v22 = vsub.f32 1.0, %v667_v11  ;;  %v772_v35 = vadd.f32 0.18741608, %v771_v15  ;;  %v634_v44 = vsel %vm2613_vm15, %v2458_v43, %v630_v19 }
  0xf7   : > { %v750_v54 = vadd.f32 %v1856_v33, %v749_v16  ;;  %vm751_vm1 = vweird.f32 %v2529_v6  ;;  %v823_v59 = vadd.f32 0.4994258, %v822_v31  ;;  %1131 = vmatmul.bf16.vlgmr.msrb.gmra.mxu0 %v859_v41  ;;  %v1537_v14 = vclamps-f32 %v600_v63, 1.0 }
  0xf8   : > { %v638_v13 = vor.u32 1.1754944e-38, %v637_v1  ;;  %vm753_vm2 = vmor %vm751_vm1, %vm752_vm14  ;;  %v758_v45 = vor.u32 1.1754944e-38, %v757_v38  ;;  %v810_v42 = vadd.f32 0.05243302, %v809_v27  ;;  %v735_v32 = vmul.f32 %v734_v29, %v2297_v58 }
  0xf9   : > { %v754_v30 = vsel %vm753_vm2, %v1856_v33, %v750_v54  ;;  %vm756_vm3 = vcmp.eq.f32.partialorder %v755_v25, 8.507059e+37  ;;  %v824_v20 = vmul.f32 %v823_v59, %v2472_v28  ;;  %v669_v51 = vmul.f32 %v2565_v60, %v668_v22 }
  0xfa   : > { %v1858_v43 = vpop.eup %1857  ;;  %v639_v6 = vsel %vm2617_vm0, %v638_v13, %v634_v44  ;;  %v759_v52 = vsel %vm756_vm3, %v758_v45, %v754_v30  ;;  %v773_v37 = vmul.f32 %v772_v35, %v2410_v62  ;;  %v615_v61 = vmul.f32 %v2468_v23, %v2245_v56 }
  0xfb   : > { %v653_v63 = vmul.f32 %v652_v57, %v2279_v26  ;;  %v760_v1 = vmul.f32 %v759_v52, %v735_v32  ;;  %v787_v58 = vmul.f32 %v1858_v43, %v2594_v53  ;;  %v844_v33 = vadd.f32 1.0, %v1537_v14 }
  0xfc   : > { %v677_v3 = vand.u32 2147483648, %v2489_v36  ;;  %v811_v2 = vmul.f32 %v810_v42, %v2472_v28  ;;  %v825_v4 = vadd.f32 1.0, %v824_v20  ;;  %v640_v18 = vmul.f32 %v639_v6, %v615_v61 }
  0xfd   : > { %vm672_vm4 = vweird.f32 %v2565_v60  ;;  %v1541_v8 = vclamps-f32 %v760_v1, 1.0  ;;  %v788_v9 = vsub.f32 1.0, %v787_v58  ;;  %v670_v62 = vadd.f32 %v2565_v60, %v669_v51 }
  0xfe   : > { %v774_v12 = vadd.f32 1.1283791, %v773_v37  ;;  %v797_v56 = vand.u32 2147483648, %v2594_v53  ;;  %1859 = vrcp.f32 %v825_v4  ;;  %vm792_vm5 = vweird.f32 %v1858_v43 }
  0xff   : > { %v848_v26 = vadd.f32 1.0, %v1541_v8  ;;  %v789_v23 = vmul.f32 %v1858_v43, %v788_v9  ;;  %v795_v11 = vand.u32 2147483647, %v2594_v53  ;;  %v654_v15 = vadd.f32 1.1283791, %v653_v63 }
 0x100   : > { %vm671_vm6 = vweird.f32 %v2489_v36  ;;  %v675_v17 = vand.u32 2147483647, %v2489_v36  ;;  %v812_v19 = vadd.f32 0.18741608, %v811_v2  ;;  %v852_v21 = vmul.f32 %v844_v33, %v2328_v34 }
 0x101   : > { %vm2647_vm7 = vmor %vm671_vm6, %vm672_vm4  ;;  %v856_v24 = vmul.f32 %v848_v26, %v2335_v39  ;;  %v790_v25 = vadd.f32 %v1858_v43, %v789_v23  ;;  %vm791_vm8 = vweird.f32 %v2594_v53  ;;  %v1538_v38 = vclamps-f32 %v640_v18, 1.0 }
 0x102   : > { %v674_v27 = vsel %vm2647_vm7, %v2565_v60, %v670_v62  ;;  %v678_v36 = vor.u32 1.1754944e-38, %v677_v3  ;;  %vm793_vm9 = vmor %vm791_vm8, %vm792_vm5  ;;  %v798_v47 = vor.u32 1.1754944e-38, %v797_v56  ;;  %v775_v34 = vmul.f32 %v774_v12, %v2368_v5 }
 0x103   : > { %v794_v49 = vsel %vm793_vm9, %v1858_v43, %v790_v25  ;;  %vm796_vm10 = vcmp.eq.f32.partialorder %v795_v11, 8.507059e+37  ;;  %v860_v16 = vpack.c.bf16 %v856_v24, %v852_v21  ;;  %vm676_vm11 = vcmp.eq.f32.partialorder %v675_v17, 8.507059e+37 }
 0x104   : > { %v1860_v31 = vpop.eup %1859  ;;  %v799_v41 = vsel %vm796_vm10, %v798_v47, %v794_v49  ;;  %v813_v39 = vmul.f32 %v812_v19, %v2472_v28  ;;  %v679_v7 = vsel %vm676_vm11, %v678_v36, %v674_v27  ;;  %v655_v57 = vmul.f32 %v654_v15, %v2264_v10 }
 0x105   : > { %v800_v53 = vmul.f32 %v799_v41, %v775_v34  ;;  %v827_v40 = vmul.f32 %v1860_v31, %v825_v4  ;;  %1145 = vmatmul.bf16.vlgmr.msrb.gmra.mxu1 %v860_v16  ;;  %v509_v60 = vmul.f32 0.5, %v2238_v50  ;;  %v845_v22 = vadd.f32 1.0, %v1538_v38 }
 0x106   : > { %v680_v5 = vmul.f32 %v679_v7, %v655_v57  ;;  %v513_v54 = vmul.f32 0.5, %v2339_v46  ;;  %v814_v59 = vadd.f32 1.1283791, %v813_v39  ;;  %v837_v14 = vand.u32 2147483648, %v825_v4 }
 0x107   : > { %v1542_v35 = vclamps-f32 %v800_v53, 1.0  ;;  %v828_v44 = vsub.f32 1.0, %v827_v40  ;;  %vm832_vm12 = vweird.f32 %v1860_v31  ;;  %v835_v28 = vand.u32 2147483647, %v825_v4 }
 0x108   : > { %v853_v42 = vmul.f32 %v845_v22, %v509_v60  ;;  %vm831_vm13 = vweird.f32 %v825_v4  ;;  %v1539_v20 = vclamps-f32 %v680_v5, 1.0  ;;  %v838_v10 = vor.u32 1.1754944e-38, %v837_v14 }
 0x109   : > { %v849_v13 = vadd.f32 1.0, %v1542_v35  ;;  %v829_v45 = vmul.f32 %v1860_v31, %v828_v44  ;;  %vm833_vm14 = vmor %vm831_vm13, %vm832_vm12  ;;  %v815_v50 = vmul.f32 %v814_v59, %v2420_v55  ;;  %vm836_vm15 = vcmp.eq.f32.partialorder %v835_v28, 8.507059e+37  ;;  %v1844_v55 = vld [vmem:[%s2717_s4] ss:$0 sm:$0xff] }
 0x10a   : > { %v846_v52 = vadd.f32 1.0, %v1539_v20  ;;  %v510_v61 = vmul.f32 0.5, %v2254_v0  ;;  %v514_v63 = vmul.f32 0.5, %v2343_v48 }
 0x10b   : > { %v857_v32 = vmul.f32 %v849_v13, %v513_v54  ;;  %v830_v30 = vadd.f32 %v1860_v31, %v829_v45 }
 0x10c   : > { %v854_v58 = vmul.f32 %v846_v52, %v510_v61 }
 0x10d   : > { %v834_v43 = vsel %vm833_vm14, %v1860_v31, %v830_v30  ;;  %v861_v6 = vpack.c.bf16 %v857_v32, %v853_v42 }
 0x10e   : > { %v839_v51 = vsel %vm836_vm15, %v838_v10, %v834_v43 }
 0x10f   : > { %v840_v46 = vmul.f32 %v839_v51, %v815_v50  ;;  %1159 = vmatmul.bf16.vlgmr.msrb.gmra.mxu2 %v861_v6 }
 0x111   : > { %v1543_v37 = vclamps-f32 %v840_v46, 1.0 }
 0x113   : > { %v850_v1 = vadd.f32 1.0, %v1543_v37 }
 0x115   : > { %v858_v33 = vmul.f32 %v850_v1, %v514_v63 }
 0x117   : > { %v862_v3 = vpack.c.bf16 %v858_v33, %v854_v58 }
 0x119   : > { %1173 = vmatmul.bf16.vlgmr.msrb.gmra.mxu3 %v862_v3 }
 0x174   : > { %v1132_v2 = vpop.f32.mrf.mxu0 }
 0x175   : > { %v1133_v4 = vadd.f32 %v1844_v55, %v1132_v2 }
 0x17c   : > { %v1134_v62 = vpop.f32.mrf.mxu0 }
 0x17d   : > { %v1135_v0 = vadd.f32 %v1844_v55, %v1134_v62 }
 0x182   : > { %v1146_v18 = vpop.f32.mrf.mxu1 }
 0x183   : > { %v1147_v9 = vadd.f32 %v1146_v18, %v1133_v4 }
 0x18a   : > { %v1148_v26 = vpop.f32.mrf.mxu1 }
 0x18b   : > { %v1149_v11 = vadd.f32 %v1148_v26, %v1135_v0 }
 0x192   : > { %v1160_v8 = vpop.f32.mrf.mxu2 }
 0x193   : > { %v1161_v12 = vadd.f32 %v1160_v8, %v1147_v9 }
 0x19a   : > { %v1162_v23 = vpop.f32.mrf.mxu2 }
 0x19b   : > { %v1163_v15 = vadd.f32 %v1162_v23, %v1149_v11 }
 0x19c   : > { %v1174_v48 = vpop.f32.mrf.mxu3 }
 0x19d   : > { %v1175_v56 = vadd.f32 %v1174_v48, %v1161_v12 }
 0x19f   : > { %1179 = vst [vmem:[%s2668_s27] sm:$0xff] %v1175_v56 }
 0x1a3   : > { %1187 = sbr.rel (!%p2004_p4) target bundleno = 463 (0x1cf), region = 44 }
 0x1a4   : > { %v1176_v17 = vpop.f32.mrf.mxu3 }
 0x1a5   : > { %v1177_v19 = vadd.f32 %v1176_v17, %v1163_v15 }
 0x1a7   : > { %1180 = vst [vmem:[%s2668_s27 + $0x8] sm:$0xff] %v1177_v19 }
 0x1a8   : > { %s2736_s18 = smov (!%p1190_p8, %s1189_s18), 2 }
 0x1a9   : > { %s1674_s7 = sshll.u32 %s2736_s18, 3 }
 0x1aa   : > { %p1677_p9 = scmp.eq.s32.totalorder %s1674_s7, 0 }
 0x1ab   : > { %s2685_s8 = sshrl.u32 (!%p1677_p9), %s2736_s18, 1 }
 0x1ac   : > { %1198 = sbr.rel (%p1677_p9) target bundleno = 463 (0x1cf), region = 48  ;;  %p1678_p10 = scmp.le.s32.totalorder (!%p1677_p9), %s2685_s8, 0 }
 0x1b1   : > { %1357 = sbr.rel (%p1678_p10) target bundleno = 446 (0x1be), region = 124  ;;  %s1917_s21 = smov (!%p1678_p10), %s2679_s6  }
 0x1b2   : > { %s1921_s26 = smov (!%p1678_p10), %s2668_s27   ;;  %s1925_s17 = smov (!%p1678_p10), 0  }
 0x1b3   : > { %s1929_s9 = smov (!%p1678_p10), 0  }
 0x1b6 LB: >> { %v1263_v21 = vld [vmem:[%s1923_s26] sm:$0xff]  ;;  %v1265_v29 = vld [vmem:[%s1923_s26 + $0x8] sm:$0xff]  ;;  %s1267_s10 = sadd.s32 1, %s1927_s17  ;;  %s1257_s9 = sadd.s32 1, %s1931_s9   ;;  %s1931_s9 = sphi %s1929_s9, %s1257_s9   ;;  %s1927_s17 = sphi %s1925_s17, %s1926_s17   ;;  %s1923_s26 = sphi %s1921_s26, %s1272_s26   ;;  %s1919_s21 = sphi %s1917_s21, %s1273_s21  }
 0x1b7   : >> { %1264 = vst [vmem:[%s1919_s21] sm:$0xff] %v1263_v21  ;;  %p1268_p11 = scmp.ge.s32.totalorder %s1267_s10, %s2685_s8  ;;  %p1256_p12 = scmp.ge.s32.totalorder %s1257_s9, %s2685_s8 }
 0x1b8   : >> { %1266 = vst [vmem:[%s1919_s21 + $0x8] sm:$0xff] %v1265_v29 }
 0x1b9   : >> { %s2738_s10 = smov (%p1268_p11, %s1267_s10), 0  ;;  %1259 = sbr.rel (!%p1256_p12) target bundleno = 438 (0x1b6), region = 130 }
 0x1ba   : >> { %s1679_s11 = sshll.u32 %s2738_s10, 4  ;;  %s1926_s17 = smov %s2738_s10  }
 0x1bb   : >> { %s1272_s26 = scalar_lea.vmem %s2668_s27, %s1679_s11 [#allocation2]   ;;  %s1273_s21 = scalar_lea.vmem %s2679_s6, %s1679_s11  }
 0x1be PF: > { %s2695_s12 = sand.u32 1, %s2736_s18   ;;  %s1754_s13 = sshll.u32 %s2685_s8, 4 }
 0x1bf   : > { %s1278_s14 = scalar_lea.vmem %s2668_s27, %s1754_s13 [#allocation2]   ;;  %s1280_s15 = scalar_lea.vmem %s2679_s6, %s1754_s13  }
 0x1c0   : > { %p1684_p13 = scmp.le.s32.totalorder %s2695_s12, 0 }
 0x1c1   : > { %s1933_s16 = smov (!%p1684_p13), %s1280_s15   ;;  %s1937_s20 = smov (!%p1684_p13), %s1278_s14  }
 0x1c2   : > { %1371 = sbr.rel (%p1684_p13) target bundleno = 463 (0x1cf), region = 135  ;;  %s1941_s23 = smov (!%p1684_p13), 0  }
 0x1c3   : > { %s1945_s24 = smov (!%p1684_p13), 0  }
 0x1c7 LB: >> { %v1290_v24 = vld [vmem:[%s1939_s20] sm:$0xff]  ;;  %s1292_s18 = sadd.s32 1, %s1943_s23  ;;  %s1284_s24 = sadd.s32 1, %s1947_s24   ;;  %s1947_s24 = sphi %s1945_s24, %s1284_s24   ;;  %s1943_s23 = sphi %s1941_s23, %s1942_s23   ;;  %s1939_s20 = sphi %s1937_s20, %s1297_s20   ;;  %s1935_s16 = sphi %s1933_s16, %s1298_s16  }
 0x1c8   : >> { %1291 = vst [vmem:[%s1935_s16] sm:$0xff] %v1290_v24  ;;  %p1293_p0 = scmp.ge.s32.totalorder %s1292_s18, %s2695_s12  ;;  %p1283_p1 = scmp.ge.s32.totalorder %s1284_s24, %s2695_s12 }
 0x1ca   : >> { %s2740_s18 = smov (%p1293_p0, %s1292_s18), 0  ;;  %1286 = sbr.rel (!%p1283_p1) target bundleno = 455 (0x1c7), region = 141 }
 0x1cb   : >> { %s1685_s27 = sshll.u32 %s2740_s18, 3  ;;  %s1942_s23 = smov %s2740_s18  }
 0x1cc   : >> { %s1297_s20 = scalar_lea.vmem %s1278_s14, %s1685_s27 [#allocation2]   ;;  %s1298_s16 = scalar_lea.vmem %s1280_s15, %s1685_s27  }
 0x1cf PF: > { %p12_p2 = scmp.ge.s32.totalorder %s1994_s22, 6   ;;  %s2732_s18 = smov %s1911_s19 }
 0x1d0   : > { %s2733_s19 = smov %s2002_s25  ;;  %s2734_s20 = smov %s1994_s22 }
 0x1d1   :  { %14 = sbr.rel (!%p12_p2) target bundleno = 2 (0x2), region = 152 }

</bundles_post_ra>
